<compile_context>
chip_gen: v7x
topology: tpu7x:2x2x1
jax: 0.10.0
libtpu: 0.0.40
codegen_flags: <defaults>
</compile_context>

<pallas_src>
import functools

import jax
import jax.numpy as jnp
from jax.experimental import pallas as pl
from jax.experimental.pallas import tpu as pltpu

# ----------------------------------------------------------------------------
# Tiling helpers
# ----------------------------------------------------------------------------
TM_MAX = 1024   # GEMM M tile (sublane dim, multiple of 8)
TN_MAX = 512    # GEMM N tile (lane dim, multiple of 128)
TK_MAX = 1024   # GEMM K tile (lane dim of A / sublane dim of B)


def _round_up(x, m):
    return (x + m - 1) // m * m


def _pick_tile(padded, tmax, step=128):
    """Largest multiple-of-`step` divisor of `padded` that is <= tmax."""
    if padded <= tmax:
        return padded
    best = step
    d = step
    while d <= tmax:
        if padded % d == 0:
            best = d
        d += step
    return best


def _choose_m(m, tmax=TM_MAX):
    mp = _round_up(m, 8)
    if mp <= tmax:
        return mp, mp
    best = 0
    d = 8
    while d <= tmax:
        if mp % d == 0:
            best = d
        d += 8
    if best >= 128:
        return best, mp
    mp = _round_up(m, 256)   # fall back: over-pad a little, keep a big tile
    return 256, mp


# ----------------------------------------------------------------------------
# Pallas kernels
# ----------------------------------------------------------------------------
def _matmul_bias_act_kernel(a_ref, b_ref, bias_ref, o_ref, acc_ref, *,
                            apply_act, slope):
    k = pl.program_id(2)

    @pl.when(k == 0)
    def _():
        acc_ref[...] = jnp.zeros_like(acc_ref)

    acc_ref[...] += jnp.dot(a_ref[...], b_ref[...],
                            preferred_element_type=jnp.float32)

    @pl.when(k == pl.num_programs(2) - 1)
    def _():
        out = acc_ref[...] + bias_ref[...]
        if apply_act:
            out = jnp.where(out >= 0, out, slope * out)
        o_ref[...] = out.astype(o_ref.dtype)   # bf16 for all inter-layer acts


def _abs_diff_sum_kernel(a_ref, b_ref, o_ref, acc_ref):
    """Per-core partial sum of |a-b|; accumulator is a small (8,128) partial."""
    i = pl.program_id(1)

    @pl.when(i == 0)
    def _():
        acc_ref[...] = jnp.zeros_like(acc_ref)

    d = jnp.abs(a_ref[...].astype(jnp.float32) - b_ref[...].astype(jnp.float32))
    br = d.shape[0]
    acc_ref[...] += jnp.sum(d.reshape(br // 8, 8, 128), axis=0)

    @pl.when(i == pl.num_programs(1) - 1)
    def _():
        o_ref[...] = acc_ref[...].reshape(o_ref.shape)


def _lpips_scale_kernel(f0_ref, f1_ref, w_ref, o_ref, acc_ref, *, eps):
    """Fused: unit-normalize channels, (n0-n1)^2, 1x1 lin weight, partial sum.

    Inputs arrive in the producer dtype (bf16) and are upcast in-register.
    Padded zero rows give 1/(0+eps) which is finite, so their contribution is
    exactly 0 (do NOT refactor to rsqrt(sumsq) or they become inf*0 = NaN).
    """
    i = pl.program_id(1)

    @pl.when(i == 0)
    def _():
        acc_ref[...] = jnp.zeros_like(acc_ref)

    f0 = f0_ref[...].astype(jnp.float32)
    f1 = f1_ref[...].astype(jnp.float32)
    inv0 = pl.reciprocal(
        jnp.sqrt(jnp.sum(f0 * f0, axis=-1, keepdims=True)) + eps, approx=True)
    inv1 = pl.reciprocal(
        jnp.sqrt(jnp.sum(f1 * f1, axis=-1, keepdims=True)) + eps, approx=True)
    d = f0 * inv0 - f1 * inv1
    contrib = d * d * w_ref[...]
    br = contrib.shape[0]
    acc_ref[...] += jnp.sum(contrib.reshape(br // 8, 8, -1), axis=0)

    @pl.when(i == pl.num_programs(1) - 1)
    def _():
        o_ref[...] = acc_ref[...].reshape(o_ref.shape)


def _rowdot_kernel(a_ref, w_ref, o_ref):
    """Cout=1 conv as a VPU dot: per-row dot(a, w) -> (TM, 1)."""
    a = a_ref[...].astype(jnp.float32)
    o_ref[...] = jnp.sum(a * w_ref[...], axis=-1, keepdims=True)


# ----------------------------------------------------------------------------
# GEMM wrapper (bf16 operands, f32 accumulation, fused bias + leaky-ReLU)
# ----------------------------------------------------------------------------
def _matmul_bias_act(a_bf16, b_p, bias_p, act_slope=None,
                     out_dtype=jnp.bfloat16):
    M, K = a_bf16.shape
    Kp, Np = b_p.shape                       # pre-padded to multiples of 128
    TM, Mp = _choose_m(M)
    TK = _pick_tile(Kp, TK_MAX)
    TN = _pick_tile(Np, TN_MAX)
    if (Mp, Kp) != (M, K):
        a_bf16 = jnp.pad(a_bf16, ((0, Mp - M), (0, Kp - K)))

    kern = functools.partial(
        _matmul_bias_act_kernel,
        apply_act=act_slope is not None,
        slope=0.0 if act_slope is None else float(act_slope))

    return pl.pallas_call(
        kern,
        out_shape=jax.ShapeDtypeStruct((Mp, Np), out_dtype),
        grid_spec=pltpu.PrefetchScalarGridSpec(
            num_scalar_prefetch=0,
            grid=(Mp // TM, Np // TN, Kp // TK),
            in_specs=[pl.BlockSpec((TM, TK), lambda i, j, k: (i, k)),
                      pl.BlockSpec((TK, TN), lambda i, j, k: (k, j)),
                      pl.BlockSpec((1, TN), lambda i, j, k: (0, j))],
            out_specs=pl.BlockSpec((TM, TN), lambda i, j, k: (i, j)),
            scratch_shapes=[pltpu.VMEM((TM, TN), jnp.float32)]),
        compiler_params=pltpu.CompilerParams(
            dimension_semantics=("parallel", "parallel", "arbitrary"),
            vmem_limit_bytes=32 * 1024 * 1024),
    )(a_bf16, b_p, bias_p)


# ----------------------------------------------------------------------------
# Conv2d = bf16 im2col (fused inside a per-layer jit) + Pallas GEMM
# ----------------------------------------------------------------------------
def _im2col(x_nhwc, kh, kw, stride, padding):
    x = x_nhwc.astype(jnp.bfloat16)
    if padding:
        x = jnp.pad(x, ((0, 0), (padding, padding), (padding, padding), (0, 0)))
    N, Hp, Wp, Cin = x.shape
    Ho = (Hp - kh) // stride + 1
    Wo = (Wp - kw) // stride + 1
    cols = []
    for i in range(kh):
        for j in range(kw):
            cols.append(x[:, i:i + stride * Ho:stride,
                          j:j + stride * Wo:stride, :])
    a = jnp.stack(cols, axis=3).reshape(N * Ho * Wo, kh * kw * Cin)
    return a, N, Ho, Wo


@functools.partial(
    jax.jit,
    static_argnames=("kh", "kw", "cout", "stride", "padding", "act_slope",
                     "out_dtype"))
def _conv2d_gemm(x_nhwc, bmat_p, bias_p, *, kh, kw, cout, stride, padding,
                 act_slope, out_dtype):
    a, N, Ho, Wo = _im2col(x_nhwc, kh, kw, stride, padding)
    out = _matmul_bias_act(a, bmat_p, bias_p, act_slope=act_slope,
                           out_dtype=out_dtype)
    return out[:N * Ho * Wo, :cout].reshape(N, Ho, Wo, cout)


def conv2d(x_nhwc, pc, stride=1, padding=0, act_slope=None,
           out_dtype=jnp.bfloat16):
    return _conv2d_gemm(x_nhwc, pc['bmat'], pc['bias'],
                        kh=pc['kh'], kw=pc['kw'], cout=pc['cout'],
                        stride=stride, padding=padding, act_slope=act_slope,
                        out_dtype=out_dtype)


@functools.partial(jax.jit, static_argnames=("kh", "kw", "stride", "padding"))
def _conv2d_cout1(x_nhwc, wrow_p, bias, *, kh, kw, stride, padding):
    """Cout=1 conv via the VPU row-dot kernel (no lane-sparse MXU GEMM)."""
    a, N, Ho, Wo = _im2col(x_nhwc, kh, kw, stride, padding)
    M, K = a.shape
    Kp = wrow_p.shape[1]
    TMr, Mp = _choose_m(M, tmax=256)
    if (Mp, Kp) != (M, K):
        a = jnp.pad(a, ((0, Mp - M), (0, Kp - K)))
    out = pl.pallas_call(
        _rowdot_kernel,
        out_shape=jax.ShapeDtypeStruct((Mp, 1), jnp.float32),
        grid_spec=pltpu.PrefetchScalarGridSpec(
            num_scalar_prefetch=0,
            grid=(Mp // TMr,),
            in_specs=[pl.BlockSpec((TMr, Kp), lambda i: (i, 0)),
                      pl.BlockSpec((1, Kp), lambda i: (0, 0))],
            out_specs=pl.BlockSpec((TMr, 1), lambda i: (i, 0))),
        compiler_params=pltpu.CompilerParams(
            dimension_semantics=("parallel",)),
    )(a, wrow_p)
    out = out[:M, :] + bias[0]
    return out.reshape(N, Ho, Wo, 1)


def conv2d_cout1(x_nhwc, pc, stride=1, padding=0):
    return _conv2d_cout1(x_nhwc, pc['wrow'], pc['bias'],
                         kh=pc['kh'], kw=pc['kw'], stride=stride,
                         padding=padding)


def _prep_conv(w_oihw, b):
    """Pre-transpose/pre-pad conv weights once at init (bf16 GEMM layout)."""
    Cout, Cin, kh, kw = w_oihw.shape
    K = kh * kw * Cin
    Kp = _round_up(K, 128)
    Np = _round_up(Cout, 128)
    bmat = jnp.transpose(w_oihw, (2, 3, 1, 0)).reshape(K, Cout)
    bmat_p = jnp.pad(bmat, ((0, Kp - K), (0, Np - Cout))).astype(jnp.bfloat16)
    bias_p = jnp.pad(b.astype(jnp.float32), (0, Np - Cout)).reshape(1, Np)
    return dict(bmat=bmat_p, bias=bias_p, cout=int(Cout), kh=int(kh),
                kw=int(kw))


def _prep_conv_cout1(w_oihw, b):
    """Cout=1 conv prepared as a single f32 weight row for the VPU kernel."""
    Cout, Cin, kh, kw = w_oihw.shape
    assert Cout == 1
    K = kh * kw * Cin
    Kp = _round_up(K, 128)
    wrow = jnp.transpose(w_oihw, (2, 3, 1, 0)).reshape(K)   # (kh, kw, Cin) order
    wrow_p = jnp.pad(wrow.astype(jnp.float32), (0, Kp - K)).reshape(1, Kp)
    return dict(wrow=wrow_p, bias=b.astype(jnp.float32), kh=int(kh),
                kw=int(kw))


# ----------------------------------------------------------------------------
# Pallas reductions (two-core split on v7x; sequential + correct on v5e/v6e)
# ----------------------------------------------------------------------------
@jax.jit
def pallas_abs_diff_mean(a, b):
    n = a.size
    fa = a.reshape(-1)
    fb = b.reshape(-1)
    rows = _round_up(-(-n // 128), 8)
    br_max = 2048
    if rows <= br_max:
        br = rows
    else:
        rows = _round_up(rows, br_max)
        br = br_max
    pad = rows * 128 - n
    fa = jnp.pad(fa, (0, pad)).reshape(rows, 128)
    fb = jnp.pad(fb, (0, pad)).reshape(rows, 128)
    steps = rows // br
    ncores = 2 if (steps % 2 == 0 and steps >= 2) else 1
    spc = steps // ncores
    out = pl.pallas_call(
        _abs_diff_sum_kernel,
        out_shape=jax.ShapeDtypeStruct((ncores, 8, 128), jnp.float32),
        grid_spec=pltpu.PrefetchScalarGridSpec(
            num_scalar_prefetch=0,
            grid=(ncores, spc),
            in_specs=[pl.BlockSpec((br, 128), lambda c, i: (c * spc + i, 0)),
                      pl.BlockSpec((br, 128), lambda c, i: (c * spc + i, 0))],
            out_specs=pl.BlockSpec((1, 8, 128), lambda c, i: (c, 0, 0)),
            scratch_shapes=[pltpu.VMEM((8, 128), jnp.float32)]),
        compiler_params=pltpu.CompilerParams(
            dimension_semantics=("parallel", "arbitrary")),
    )(fa, fb)
    return jnp.sum(out) / n


@jax.jit
def lpips_scale_mean(f0_nhwc, f1_nhwc, w_vec):
    """mean over (n,h,w) of sum_c w_c * (unit(f0) - unit(f1))^2, fully fused."""
    n, h, w, c = f0_nhwc.shape
    m = n * h * w
    f0 = f0_nhwc.reshape(m, c)          # stays bf16 -> half the HBM reads
    f1 = f1_nhwc.reshape(m, c)
    br_max = 1024
    mp = _round_up(m, 8)
    if mp <= br_max:
        br = mp
    else:
        mp = _round_up(m, br_max)
        br = br_max
    if mp != m:
        f0 = jnp.pad(f0, ((0, mp - m), (0, 0)))   # zero rows contribute 0
        f1 = jnp.pad(f1, ((0, mp - m), (0, 0)))
    steps = mp // br
    ncores = 2 if (steps % 2 == 0 and steps >= 2) else 1
    spc = steps // ncores
    w_row = w_vec.reshape(1, c).astype(jnp.float32)
    out = pl.pallas_call(
        functools.partial(_lpips_scale_kernel, eps=1e-10),
        out_shape=jax.ShapeDtypeStruct((ncores, 8, c), jnp.float32),
        grid_spec=pltpu.PrefetchScalarGridSpec(
            num_scalar_prefetch=0,
            grid=(ncores, spc),
            in_specs=[pl.BlockSpec((br, c), lambda cc, i: (cc * spc + i, 0)),
                      pl.BlockSpec((br, c), lambda cc, i: (cc * spc + i, 0)),
                      pl.BlockSpec((1, c), lambda cc, i: (0, 0))],
            out_specs=pl.BlockSpec((1, 8, c), lambda cc, i: (cc, 0, 0)),
            scratch_shapes=[pltpu.VMEM((8, c), jnp.float32)]),
        compiler_params=pltpu.CompilerParams(
            dimension_semantics=("parallel", "arbitrary")),
    )(f0, f1, w_row)
    return jnp.sum(out) / m


# ----------------------------------------------------------------------------
# LPIPS (VGG16 features + fused 1x1 lins).  Weights are deterministic
# synthetic init (no pretrained checkpoint is loaded).
# ----------------------------------------------------------------------------
_VGG_CFG = [(3, 64), (64, 64), (64, 128), (128, 128), (128, 256), (256, 256),
            (256, 256), (256, 512), (512, 512), (512, 512), (512, 512),
            (512, 512), (512, 512)]
_VGG_OPS = ['C', 'C', 'T', 'M', 'C', 'C', 'T', 'M', 'C', 'C', 'C', 'T', 'M',
            'C', 'C', 'C', 'T', 'M', 'C', 'C', 'C', 'T']
_LPIPS_CHNS = [64, 128, 256, 512, 512]


def lpips_mean(params, x0_nchw, x1_nchw):
    """Mean over samples of LPIPS(x0, x1); both inputs share one VGG pass."""
    n = x0_nchw.shape[0]
    shift = jnp.array([-0.030, -0.088, -0.188], jnp.float32).reshape(1, 1, 1, 3)
    scale = jnp.array([0.458, 0.448, 0.450], jnp.float32).reshape(1, 1, 1, 3)

    x = jnp.concatenate([x0_nchw, x1_nchw], axis=0)        # batch-concat
    h = (jnp.transpose(x, (0, 2, 3, 1)) - shift) / scale
    feats, ci = [], 0
    for op in _VGG_OPS:
        if op == 'C':
            h = conv2d(h, params['vgg'][ci], stride=1, padding=1,
                       act_slope=0.0)                      # fused ReLU, bf16 out
            ci += 1
        elif op == 'T':
            feats.append(h)
        else:  # 2x2 max pool, stride 2
            nb, hh, ww, cc = h.shape
            h = h.reshape(nb, hh // 2, 2, ww // 2, 2, cc).max(axis=(2, 4))

    total = jnp.float32(0.0)
    for kk, f in enumerate(feats):
        total = total + lpips_scale_mean(f[:n], f[n:], params['lins'][kk])
    return total


# ----------------------------------------------------------------------------
# NLayerDiscriminator (PatchGAN, kw=4, BatchNorm, LeakyReLU 0.2)
# ----------------------------------------------------------------------------
def discriminator_forward(params, x_nchw):
    h = jnp.transpose(x_nchw, (0, 2, 3, 1))                # NHWC
    h = conv2d(h, params['d0'], stride=2, padding=1, act_slope=0.2)
    for (pc, gamma, beta, stride) in params['d_bn']:
        h = conv2d(h, pc, stride=stride, padding=1, act_slope=None)
        # BatchNorm2d (training-mode batch statistics) + LeakyReLU(0.2) — glue.
        hf = h.astype(jnp.float32)
        mean = jnp.mean(hf, axis=(0, 1, 2), keepdims=True)
        var = jnp.var(hf, axis=(0, 1, 2), keepdims=True)
        hf = (hf - mean) * jax.lax.rsqrt(var + 1e-5) * gamma.reshape(1, 1, 1, -1) \
            + beta.reshape(1, 1, 1, -1)
        h = jnp.where(hf >= 0, hf, 0.2 * hf).astype(jnp.bfloat16)
    h = conv2d_cout1(h, params['df'], stride=1, padding=1)  # f32 logits
    return jnp.transpose(h, (0, 3, 1, 2))                  # logits in NCHW


# ----------------------------------------------------------------------------
# Loss helpers (mirror the PyTorch free functions; logits are tiny -> XLA)
# ----------------------------------------------------------------------------
def adopt_weight(weight, global_step, threshold=0, value=0.0):
    # trace-safe version of the torch helper (global_step may be traced).
    return jnp.where(jnp.asarray(global_step) < threshold,
                     jnp.float32(value), jnp.float32(weight))


def hinge_d_loss(logits_real, logits_fake):
    loss_real = jnp.mean(jax.nn.relu(1.0 - logits_real))
    loss_fake = jnp.mean(jax.nn.relu(1.0 + logits_fake))
    return 0.5 * (loss_real + loss_fake)


def vanilla_d_loss(logits_real, logits_fake):
    return 0.5 * (jnp.mean(jax.nn.softplus(-logits_real)) +
                  jnp.mean(jax.nn.softplus(logits_fake)))


# ----------------------------------------------------------------------------
# Parameter initialisation (deterministic, synthetic)
# ----------------------------------------------------------------------------
def init_params(key, disc_in_channels=3, ndf=64, n_layers=3, kw=4):
    keys = jax.random.split(key, 64)
    ki = iter(range(64))

    def nk():
        return keys[next(ki)]

    params = {}
    vgg = []
    for cin, cout in _VGG_CFG:
        std = (2.0 / (cin * 9)) ** 0.5
        w = std * jax.random.normal(nk(), (cout, cin, 3, 3), jnp.float32)
        vgg.append(_prep_conv(w, jnp.zeros((cout,), jnp.float32)))
    params['vgg'] = vgg
    params['lins'] = [0.01 * jnp.abs(jax.random.normal(nk(), (c,), jnp.float32))
                      for c in _LPIPS_CHNS]

    # weights_init: conv ~ N(0, 0.02); BN gamma ~ N(1, 0.02), beta = 0
    w0 = 0.02 * jax.random.normal(nk(), (ndf, disc_in_channels, kw, kw),
                                  jnp.float32)
    params['d0'] = _prep_conv(w0, jnp.zeros((ndf,), jnp.float32))

    specs, nf_mult = [], 1
    for n in range(1, n_layers):
        nf_prev, nf_mult = nf_mult, min(2 ** n, 8)
        specs.append((ndf * nf_prev, ndf * nf_mult, 2))
    nf_prev, nf_mult = nf_mult, min(2 ** n_layers, 8)
    specs.append((ndf * nf_prev, ndf * nf_mult, 1))

    bn_layers = []
    for cin, cout, stride in specs:
        w = 0.02 * jax.random.normal(nk(), (cout, cin, kw, kw), jnp.float32)
        gamma = 1.0 + 0.02 * jax.random.normal(nk(), (cout,), jnp.float32)
        beta = jnp.zeros((cout,), jnp.float32)
        bn_layers.append((_prep_conv(w, jnp.zeros((cout,), jnp.float32)),
                          gamma, beta, stride))
    params['d_bn'] = bn_layers
    wf = 0.02 * jax.random.normal(nk(), (1, ndf * nf_mult, kw, kw), jnp.float32)
    params['df'] = _prep_conv_cout1(wf, jnp.zeros((1,), jnp.float32))
    return params


# ----------------------------------------------------------------------------
# VQLPIPSWithDiscriminator.forward
# ----------------------------------------------------------------------------
CFG = dict(disc_start=0, codebook_weight=1.0, pixelloss_weight=1.0,
           disc_factor=1.0, disc_weight=1.0, perceptual_weight=1.0,
           disc_conditional=False, disc_loss='hinge')


def vq_lpips_with_discriminator_forward(params, codebook_loss, inputs,
                                        reconstructions, optimizer_idx,
                                        global_step, last_layer=None,
                                        cond=None, split='train', cfg=CFG):
    # rec_loss = |x - x_rec| (+ perceptual_weight * p_loss); only means needed
    l1_mean = pallas_abs_diff_mean(inputs, reconstructions)
    if cfg['perceptual_weight'] > 0:
        p_loss_mean = lpips_mean(params, inputs[:, :3], reconstructions[:, :3])
    else:
        p_loss_mean = jnp.float32(0.0)
    rec_loss_mean = l1_mean + cfg['perceptual_weight'] * p_loss_mean
    nll_loss = rec_loss_mean

    disc_factor = adopt_weight(cfg['disc_factor'], global_step,
                               threshold=cfg['disc_start'])
    disc_loss_fn = hinge_d_loss if cfg['disc_loss'] == 'hinge' else vanilla_d_loss

    if optimizer_idx == 0:
        if cond is None:
            logits_fake = discriminator_forward(params, reconstructions)
        else:
            logits_fake = discriminator_forward(
                params, jnp.concatenate([reconstructions, cond], axis=1))
        g_loss = -jnp.mean(logits_fake)
        # TODO(synk): calculate_adaptive_weight needs autograd grads of nll/g_loss
        # w.r.t. the generator's last layer, which is not reachable from these
        # forward inputs; we reproduce the torch RuntimeError fallback (d_weight=0).
        d_weight = jnp.float32(0.0) * cfg['disc_weight']
        loss = (nll_loss + d_weight * disc_factor * g_loss
                + cfg['codebook_weight'] * jnp.mean(codebook_loss))
        log = {f'{split}/total_loss': loss,
               f'{split}/quant_loss': jnp.mean(codebook_loss),
               f'{split}/rec_loss': rec_loss_mean,
               f'{split}/p_loss': p_loss_mean,
               f'{split}/d_weight': d_weight,
               f'{split}/disc_factor': jnp.asarray(disc_factor, jnp.float32),
               f'{split}/g_loss': g_loss}
        return loss, log

    if optimizer_idx == 1:
        # NOTE: real/fake are run as two separate passes to preserve the
        # training-mode BatchNorm statistics of the PyTorch reference.
        if cond is None:
            logits_real = discriminator_forward(params, inputs)
            logits_fake = discriminator_forward(params, reconstructions)
        else:
            logits_real = discriminator_forward(
                params, jnp.concatenate([inputs, cond], axis=1))
            logits_fake = discriminator_forward(
                params, jnp.concatenate([reconstructions, cond], axis=1))
        d_loss = disc_factor * disc_loss_fn(logits_real, logits_fake)
        log = {f'{split}/disc_loss': d_loss,
               f'{split}/logits_real': jnp.mean(logits_real),
               f'{split}/logits_fake': jnp.mean(logits_fake)}
        return d_loss, log


# ----------------------------------------------------------------------------
if __name__ == "__main__":
    key = jax.random.PRNGKey(0)
    k_params, k_in, k_rec, k_cb = jax.random.split(key, 4)

    params = init_params(k_params)

    # NCHW inputs (batch=2, 3 channels, 32x32 spatial — min size for the default
    # 3-layer kw=4 PatchGAN discriminator).
    inputs = jax.random.normal(k_in, (2, 3, 32, 32), jnp.float32)
    reconstructions = inputs + 0.1 * jax.random.normal(k_rec, (2, 3, 32, 32),
                                                       jnp.float32)
    codebook_loss = jnp.abs(jax.random.normal(k_cb, (1,), jnp.float32))

    loss_g, log_g = vq_lpips_with_discriminator_forward(
        params, codebook_loss, inputs, reconstructions,
        optimizer_idx=0, global_step=1)
    loss_d, log_d = vq_lpips_with_discriminator_forward(
        params, codebook_loss, inputs, reconstructions,
        optimizer_idx=1, global_step=1)

    jax.block_until_ready((loss_g, log_g, loss_d, log_d))
    print("KERNEL_OK")
</pallas_src>

<mosaic_0001>
module attributes {stable_mosaic.version = 11 : i64} {
  func.func @_abs_diff_sum_kernel(%arg0: i32, %arg1: i32, %arg2: memref<48x128xf32, #tpu.memory_space<vmem>>, %arg3: memref<48x128xf32, #tpu.memory_space<vmem>>, %arg4: memref<1x8x128xf32, #tpu.memory_space<vmem>>, %arg5: memref<8x128xf32, #tpu.memory_space<vmem>>) attributes {dimension_semantics = [#tpu.dimension_semantics<parallel>, #tpu.dimension_semantics<arbitrary>], iteration_bounds = array<i64: 1, 1>, scalar_prefetch = 0 : i64, scratch_operands = 1 : i64, tpu.core_type = #tpu.core_type<tc>, window_params = [{transform_indices = @transform_0, window_bounds = array<i64: 48, 128>}, {transform_indices = @transform_1, window_bounds = array<i64: 48, 128>}, {transform_indices = @transform_2, window_bounds = array<i64: 1, 8, 128>}]} {
    %c0_i32 = arith.constant 0 : i32
    %0 = arith.cmpi eq, %arg1, %c0_i32 : i32
    %1 = arith.extui %0 : i1 to i32
    %c0_i32_0 = arith.constant 0 : i32
    %2 = arith.cmpi ne, %1, %c0_i32_0 : i32
    scf.if %2 {
      %cst_10 = arith.constant 0.000000e+00 : f32
      %15 = vector.broadcast %cst_10 : f32 to vector<8x128xf32>
      %c0_11 = arith.constant 0 : index
      %c0_12 = arith.constant 0 : index
      %16 = vector.load %arg5[%c0_11, %c0_12] : memref<8x128xf32, #tpu.memory_space<vmem>>, vector<8x128xf32>
      tpu.vector_store %arg5[%c0_11, %c0_12], %15 {strides = array<i32>} : memref<8x128xf32, #tpu.memory_space<vmem>>, vector<8x128xf32>,
    } else {
    }
    %c0 = arith.constant 0 : index
    %c0_1 = arith.constant 0 : index
    %3 = vector.load %arg2[%c0, %c0_1] : memref<48x128xf32, #tpu.memory_space<vmem>>, vector<48x128xf32>
    %c0_2 = arith.constant 0 : index
    %c0_3 = arith.constant 0 : index
    %4 = vector.load %arg3[%c0_2, %c0_3] : memref<48x128xf32, #tpu.memory_space<vmem>>, vector<48x128xf32>
    %5 = arith.subf %3, %4 : vector<48x128xf32>
    %6 = math.absf %5 : vector<48x128xf32>
    %c0_4 = arith.constant 0 : index
    %c0_5 = arith.constant 0 : index
    %7 = vector.load %arg5[%c0_4, %c0_5] : memref<8x128xf32, #tpu.memory_space<vmem>>, vector<8x128xf32>
    %8 = vector.shape_cast %6 : vector<48x128xf32> to vector<6x8x128xf32>
    %cst = arith.constant dense<0.000000e+00> : vector<8x128xf32>
    %9 = vector.multi_reduction <add>, %8, %cst [0] : vector<6x8x128xf32> to vector<8x128xf32>
    %10 = arith.addf %7, %9 : vector<8x128xf32>
    %c0_6 = arith.constant 0 : index
    %c0_7 = arith.constant 0 : index
    %11 = vector.load %arg5[%c0_6, %c0_7] : memref<8x128xf32, #tpu.memory_space<vmem>>, vector<8x128xf32>
    tpu.vector_store %arg5[%c0_6, %c0_7], %10 {strides = array<i32>} : memref<8x128xf32, #tpu.memory_space<vmem>>, vector<8x128xf32>,
    %c0_i32_8 = arith.constant 0 : i32
    %12 = arith.cmpi eq, %arg1, %c0_i32_8 : i32
    %13 = arith.extui %12 : i1 to i32
    %c0_i32_9 = arith.constant 0 : i32
    %14 = arith.cmpi ne, %13, %c0_i32_9 : i32
    scf.if %14 {
      %c0_10 = arith.constant 0 : index
      %c0_11 = arith.constant 0 : index
      %15 = vector.load %arg5[%c0_10, %c0_11] : memref<8x128xf32, #tpu.memory_space<vmem>>, vector<8x128xf32>
      %16 = vector.shape_cast %15 : vector<8x128xf32> to vector<1x8x128xf32>
      %c0_12 = arith.constant 0 : index
      %c0_13 = arith.constant 0 : index
      %c0_14 = arith.constant 0 : index
      %17 = vector.load %arg4[%c0_12, %c0_13, %c0_14] : memref<1x8x128xf32, #tpu.memory_space<vmem>>, vector<1x8x128xf32>
      tpu.vector_store %arg4[%c0_12, %c0_13, %c0_14], %16 {strides = array<i32>} : memref<1x8x128xf32, #tpu.memory_space<vmem>>, vector<1x8x128xf32>,
    } else {
    }
    return
  }
  func.func @transform_0(%arg0: i32, %arg1: i32) -> (i32, i32) {
    %c1_i32 = arith.constant 1 : i32
    %0 = arith.muli %arg0, %c1_i32 : i32
    %1 = arith.addi %0, %arg1 : i32
    %c0_i32 = arith.constant 0 : i32
    %c0_i32_0 = arith.constant 0 : i32
    return %1, %c0_i32 : i32, i32
  }
  func.func @transform_1(%arg0: i32, %arg1: i32) -> (i32, i32) {
    %c1_i32 = arith.constant 1 : i32
    %0 = arith.muli %arg0, %c1_i32 : i32
    %1 = arith.addi %0, %arg1 : i32
    %c0_i32 = arith.constant 0 : i32
    %c0_i32_0 = arith.constant 0 : i32
    return %1, %c0_i32 : i32, i32
  }
  func.func @transform_2(%arg0: i32, %arg1: i32) -> (i32, i32, i32) {
    %c0_i32 = arith.constant 0 : i32
    %c0_i32_0 = arith.constant 0 : i32
    %c0_i32_1 = arith.constant 0 : i32
    return %arg0, %c0_i32, %c0_i32_0 : i32, i32, i32
  }
}

</mosaic_0001>

<bundles_post_ra>
// kernel: pallas_abs_diff_mean.1
= control target key start
LH: loop header
LB: loop body
LE: loop exit
PB: predicated region body
PF: predicated region fallthrough
CT: control target
= control target key end

     0   :  { %s167_s0 = inlined_call_operand.vmem [shape: f32[48,128], index: 0, kind: input, shape index: {}]   ;;  %s168_s1 = inlined_call_operand.vmem [shape: f32[48,128], index: 1, kind: input, shape index: {}]   ;;  %s169_s2 = inlined_call_operand.vmem [shape: f32[1,8,128], index: 2, kind: output, shape index: {}]  }
   0x1   :  { %v60_v0 = vld [vmem:[%s167_s0] sm:$0xff]  ;;  %v61_v1 = vld [vmem:[%s167_s0 + $0x8] sm:$0xff]  ;;  %v62_v2 = vld [vmem:[%s167_s0 + $0x10] sm:$0xff] }
   0x2   :  { %v63_v3 = vld [vmem:[%s167_s0 + $0x18] sm:$0xff]  ;;  %v64_v4 = vld [vmem:[%s167_s0 + $0x20] sm:$0xff]  ;;  %v67_v6 = vld [vmem:[%s168_s1 + $0x8] sm:$0xff] }
   0x3   :  { %v66_v5 = vld [vmem:[%s168_s1] sm:$0xff]  ;;  %v68_v7 = vld [vmem:[%s168_s1 + $0x10] sm:$0xff]  ;;  %v69_v8 = vld [vmem:[%s168_s1 + $0x18] sm:$0xff]  ;;  %v73_v11 = vsub.f32 %v61_v1, %v67_v6 }
   0x4   :  { %v70_v9 = vld [vmem:[%s168_s1 + $0x20] sm:$0xff]  ;;  %v72_v10 = vsub.f32 %v60_v0, %v66_v5  ;;  %v74_v12 = vsub.f32 %v62_v2, %v68_v7  ;;  %v65_v13 = vld [vmem:[%s167_s0 + $0x28] sm:$0xff]  ;;  %v75_v15 = vsub.f32 %v63_v3, %v69_v8 }
   0x5   :  { %v71_v14 = vld [vmem:[%s168_s1 + $0x28] sm:$0xff]  ;;  %v76_v16 = vsub.f32 %v64_v4, %v70_v9  ;;  %v79_v18 = vand.u32 2147483647, %v73_v11 }
   0x6   :  { %v78_v17 = vand.u32 2147483647, %v72_v10  ;;  %v80_v19 = vand.u32 2147483647, %v74_v12  ;;  %v77_v20 = vsub.f32 %v65_v13, %v71_v14  ;;  %v81_v21 = vand.u32 2147483647, %v75_v15 }
   0x7   :  { %v82_v23 = vand.u32 2147483647, %v76_v16 }
   0x8   :  { %v85_v22 = vadd.f32 %v79_v18, %v78_v17  ;;  %v83_v25 = vand.u32 2147483647, %v77_v20 }
   0xa   :  { %v86_v24 = vadd.f32 %v85_v22, %v80_v19 }
   0xc   :  { %v87_v26 = vadd.f32 %v86_v24, %v81_v21 }
   0xe   :  { %v88_v27 = vadd.f32 %v87_v26, %v82_v23 }
  0x10   :  { %v89_v28 = vadd.f32 %v88_v27, %v83_v25 }
  0x12   :  { %96 = vst [vmem:[%s169_s2] sm:$0xff] %v89_v28 }

</bundles_post_ra>
